<compile_context>
chip_gen: v7x
topology: tpu7x:2x2x1
jax: 0.10.0
libtpu: 0.0.40
codegen_flags: <defaults>
</compile_context>

<pallas_src>
import jax
import jax.numpy as jnp
from jax.experimental import pallas as pl
from jax.experimental.pallas import tpu as pltpu

LN_EPS = 1e-5  # nn.LayerNorm default


def _feature_projection_kernel(x_ref, w_ref, wsum_ref, b_ref, o_ref):
    # x_ref:    (C_in, tt)  channel-major input block
    # w_ref:    (C_out, C_in)  conv weight with LN gamma pre-folded in
    # wsum_ref: (C_out, 1)  row sums of the folded weight (f32)
    # b_ref:    (C_out, 1)  conv bias with LN beta pre-folded in (f32)
    xm = x_ref[...]                                           # (C_in, tt), input dtype
    x = xm.astype(jnp.float32)
    inv_c = jnp.float32(1.0 / x.shape[0])

    # LayerNorm stats over the channel axis (axis 0) — single pass, f32.
    s = jnp.sum(x, axis=0, keepdims=True)                     # (1, tt)
    ss = jnp.sum(x * x, axis=0, keepdims=True)                # (1, tt)
    mean = s * inv_c
    var = jnp.maximum(ss * inv_c - mean * mean, 0.0)
    rstd = jax.lax.rsqrt(var + LN_EPS)                        # (1, tt)

    # 1x1 Conv1d on the *raw* block (gamma folded into W); f32 accumulation on the MXU.
    z = jnp.dot(w_ref[...], xm.astype(w_ref.dtype),
                preferred_element_type=jnp.float32)           # (C_out, tt)

    # y = rstd * (W_g @ (x - mean)) + (W @ beta + b)
    y = (z - mean * wsum_ref[...]) * rstd + b_ref[...]

    # TODO(synk): nn.Dropout(0.1) is identity in eval mode; training-mode dropout not implemented.
    o_ref[...] = y.astype(o_ref.dtype)


def feature_projection(x_nct, conv_w, conv_b, ln_w, ln_b, *, tt=512, mxu_dtype=None):
    """x_nct: (N, C_in, T). conv_w: (C_out, C_in, 1). Returns (N, C_out, T).

    tt:        time-axis tile (rounded to a multiple of 128, clamped to padded T).
    mxu_dtype: dtype of the matmul operands (e.g. jnp.bfloat16 on v6e/v7x for ~2x MXU
               throughput); defaults to the input dtype. LN stats & accumulation stay f32.
    """
    N, C_in, T = x_nct.shape
    C_out = conv_w.shape[0]
    out_dtype = x_nct.dtype
    if mxu_dtype is None:
        mxu_dtype = x_nct.dtype

    # Tile selection: multiple of 128 lanes, no bigger than the (minimally) padded sequence.
    tt = max(128, -(-int(tt) // 128) * 128)
    t_pad_min = -(-T // 128) * 128
    tt = min(tt, t_pad_min)
    T_pad = -(-T // tt) * tt

    x_p = x_nct
    if T_pad != T:
        # Zero padding is LN-safe (mean=var=0 -> finite output), sliced off below.
        x_p = jnp.pad(x_nct, ((0, 0), (0, 0), (0, T_pad - T)))

    # Fold LN affine params into the projection (wrapper-side, f32):
    #   W_g = W * gamma,   wsum = W_g @ 1,   b2 = W @ beta + b
    w_f32 = conv_w[:, :, 0].astype(jnp.float32)                       # (C_out, C_in)
    w_g = w_f32 * ln_w.astype(jnp.float32)[None, :]                   # (C_out, C_in)
    wsum = jnp.sum(w_g, axis=1, keepdims=True)                        # (C_out, 1)
    b2 = (w_f32 @ ln_b.astype(jnp.float32).reshape(C_in, 1)
          + conv_b.astype(jnp.float32).reshape(C_out, 1))             # (C_out, 1)
    w_g = w_g.astype(mxu_dtype)

    # VMEM budget: double-buffered x/out blocks + resident weight/params (+ slack),
    # clamped to 64 MiB so the same tile choice is valid on v7x (64 MiB physical VMEM).
    est = (2 * C_in * tt * x_p.dtype.itemsize
           + 2 * C_out * tt * jnp.dtype(out_dtype).itemsize
           + C_out * C_in * jnp.dtype(mxu_dtype).itemsize
           + 2 * C_out * 4)
    vmem_limit = int(min(64 * 1024 * 1024, max(32 * 1024 * 1024, 2 * est)))

    out = pl.pallas_call(
        _feature_projection_kernel,
        out_shape=jax.ShapeDtypeStruct((N, C_out, T_pad), out_dtype),
        grid_spec=pltpu.PrefetchScalarGridSpec(
            num_scalar_prefetch=0,
            grid=(N, T_pad // tt),
            in_specs=[
                pl.BlockSpec((None, C_in, tt), lambda n, t: (n, 0, t)),
                pl.BlockSpec((C_out, C_in), lambda n, t: (0, 0)),
                pl.BlockSpec((C_out, 1), lambda n, t: (0, 0)),
                pl.BlockSpec((C_out, 1), lambda n, t: (0, 0)),
            ],
            out_specs=pl.BlockSpec((None, C_out, tt), lambda n, t: (n, 0, t)),
        ),
        compiler_params=pltpu.CompilerParams(
            dimension_semantics=("parallel", "parallel"),
            vmem_limit_bytes=vmem_limit),
    )(x_p, w_g, wsum, b2)

    if T_pad != T:
        out = out[:, :, :T]
    return out


def feature_projection_ref(x_nct, conv_w, conv_b, ln_w, ln_b):
    """Pure-JAX reference matching the PyTorch forward (eval mode)."""
    x = jnp.transpose(x_nct, (0, 2, 1)).astype(jnp.float32)   # (N, T, C_in)
    mean = jnp.mean(x, axis=-1, keepdims=True)
    var = jnp.mean((x - mean) ** 2, axis=-1, keepdims=True)
    xn = (x - mean) / jnp.sqrt(var + LN_EPS)
    xn = xn * ln_w + ln_b
    y = jnp.einsum("ntc,oc->nto", xn, conv_w[:, :, 0]) + conv_b
    return jnp.transpose(y, (0, 2, 1)).astype(x_nct.dtype)


if __name__ == "__main__":
    key = jax.random.PRNGKey(0)
    k_x, k_w, k_b, k_g, k_beta = jax.random.split(key, 5)

    N, C_in, C_out, T = 2, 32, 64, 16

    x = jax.random.normal(k_x, (N, C_in, T), dtype=jnp.float32)
    conv_w = jax.random.normal(k_w, (C_out, C_in, 1), dtype=jnp.float32) * 0.1
    conv_b = jax.random.normal(k_b, (C_out,), dtype=jnp.float32) * 0.1
    ln_w = 1.0 + 0.1 * jax.random.normal(k_g, (C_in,), dtype=jnp.float32)
    ln_b = 0.1 * jax.random.normal(k_beta, (C_in,), dtype=jnp.float32)

    # 1) Default f32 path (T padded 16 -> 128 internally).
    out = jax.block_until_ready(feature_projection(x, conv_w, conv_b, ln_w, ln_b))
    ref = feature_projection_ref(x, conv_w, conv_b, ln_w, ln_b)
    assert out.shape == (N, C_out, T)
    assert jnp.allclose(out, ref, atol=2e-4, rtol=2e-4), float(jnp.abs(out - ref).max())

    # 2) Non-divisible T with a multi-tile grid (pad + slice path).
    T2 = 300
    x2 = jax.random.normal(k_x, (N, C_in, T2), dtype=jnp.float32)
    out2 = jax.block_until_ready(
        feature_projection(x2, conv_w, conv_b, ln_w, ln_b, tt=128))
    ref2 = feature_projection_ref(x2, conv_w, conv_b, ln_w, ln_b)
    assert out2.shape == (N, C_out, T2)
    assert jnp.allclose(out2, ref2, atol=2e-4, rtol=2e-4), float(jnp.abs(out2 - ref2).max())

    # 3) bf16 MXU-operand fast path (v6e/v7x); f32 LN stats/accumulation, looser tolerance.
    out3 = jax.block_until_ready(
        feature_projection(x, conv_w, conv_b, ln_w, ln_b, mxu_dtype=jnp.bfloat16))
    assert jnp.allclose(out3, ref, atol=5e-2, rtol=5e-2), float(jnp.abs(out3 - ref).max())

    print("KERNEL_OK")
</pallas_src>

<mosaic_0001>
module attributes {stable_mosaic.version = 11 : i64} {
  func.func @_feature_projection_kernel(%arg0: i32, %arg1: i32, %arg2: memref<1x32x128xf32, #tpu.memory_space<vmem>>, %arg3: memref<64x32xf32, #tpu.memory_space<vmem>>, %arg4: memref<64x1xf32, #tpu.memory_space<vmem>>, %arg5: memref<64x1xf32, #tpu.memory_space<vmem>>, %arg6: memref<1x64x128xf32, #tpu.memory_space<vmem>>) attributes {dimension_semantics = [#tpu.dimension_semantics<parallel>, #tpu.dimension_semantics<parallel>], iteration_bounds = array<i64: 2, 1>, scalar_prefetch = 0 : i64, scratch_operands = 0 : i64, tpu.core_type = #tpu.core_type<tc>, window_params = [{transform_indices = @transform_0, window_bounds = array<i64: 1, 32, 128>}, {pipeline_mode = #tpu.pipeline_mode<synchronous>, transform_indices = @transform_1, window_bounds = array<i64: 64, 32>}, {pipeline_mode = #tpu.pipeline_mode<synchronous>, transform_indices = @transform_2, window_bounds = array<i64: 64, 1>}, {pipeline_mode = #tpu.pipeline_mode<synchronous>, transform_indices = @transform_3, window_bounds = array<i64: 64, 1>}, {transform_indices = @transform_4, window_bounds = array<i64: 1, 64, 128>}]} {
    %c0 = arith.constant 0 : index
    %c0_0 = arith.constant 0 : index
    %c0_1 = arith.constant 0 : index
    %0 = vector.load %arg2[%c0, %c0_0, %c0_1] : memref<1x32x128xf32, #tpu.memory_space<vmem>>, vector<1x32x128xf32>
    %1 = vector.shape_cast %0 : vector<1x32x128xf32> to vector<32x128xf32>
    %cst = arith.constant dense<0.000000e+00> : vector<128xf32>
    %2 = vector.multi_reduction <add>, %1, %cst [0] : vector<32x128xf32> to vector<128xf32>
    %3 = vector.shape_cast %2 : vector<128xf32> to vector<1x128xf32>
    %4 = arith.mulf %1, %1 : vector<32x128xf32>
    %cst_2 = arith.constant dense<0.000000e+00> : vector<128xf32>
    %5 = vector.multi_reduction <add>, %4, %cst_2 [0] : vector<32x128xf32> to vector<128xf32>
    %6 = vector.shape_cast %5 : vector<128xf32> to vector<1x128xf32>
    %cst_3 = arith.constant 3.125000e-02 : f32
    %7 = vector.broadcast %cst_3 : f32 to vector<1x128xf32>
    %8 = arith.mulf %3, %7 : vector<1x128xf32>
    %cst_4 = arith.constant 3.125000e-02 : f32
    %9 = vector.broadcast %cst_4 : f32 to vector<1x128xf32>
    %10 = arith.mulf %6, %9 : vector<1x128xf32>
    %11 = arith.mulf %8, %8 : vector<1x128xf32>
    %12 = arith.subf %10, %11 : vector<1x128xf32>
    %cst_5 = arith.constant 0.000000e+00 : f32
    %13 = vector.broadcast %cst_5 : f32 to vector<1x128xf32>
    %14 = arith.maximumf %12, %13 : vector<1x128xf32>
    %cst_6 = arith.constant 9.99999974E-6 : f32
    %15 = vector.broadcast %cst_6 : f32 to vector<1x128xf32>
    %16 = arith.addf %14, %15 : vector<1x128xf32>
    %17 = math.rsqrt %16 : vector<1x128xf32>
    %c0_7 = arith.constant 0 : index
    %c0_8 = arith.constant 0 : index
    %18 = vector.load %arg3[%c0_7, %c0_8] : memref<64x32xf32, #tpu.memory_space<vmem>>, vector<64x32xf32>
    %cst_9 = arith.constant dense<0.000000e+00> : vector<64x128xf32>
    %19 = tpu.matmul %18, %1, %cst_9 {dimension_numbers = #tpu.dot_dimension_numbers<[1], [0], [0], [1], [0, 0, 1, 1], [], []>} : vector<64x32xf32>, vector<32x128xf32>, vector<64x128xf32> -> vector<64x128xf32>
    %c0_10 = arith.constant 0 : index
    %c0_11 = arith.constant 0 : index
    %20 = vector.load %arg4[%c0_10, %c0_11] : memref<64x1xf32, #tpu.memory_space<vmem>>, vector<64x1xf32>
    %21 = vector.broadcast %8 : vector<1x128xf32> to vector<64x128xf32>
    %22 = vector.broadcast %20 : vector<64x1xf32> to vector<64x128xf32>
    %23 = arith.mulf %21, %22 : vector<64x128xf32>
    %24 = arith.subf %19, %23 : vector<64x128xf32>
    %25 = vector.broadcast %17 : vector<1x128xf32> to vector<64x128xf32>
    %26 = arith.mulf %24, %25 : vector<64x128xf32>
    %c0_12 = arith.constant 0 : index
    %c0_13 = arith.constant 0 : index
    %27 = vector.load %arg5[%c0_12, %c0_13] : memref<64x1xf32, #tpu.memory_space<vmem>>, vector<64x1xf32>
    %28 = vector.broadcast %27 : vector<64x1xf32> to vector<64x128xf32>
    %29 = arith.addf %26, %28 : vector<64x128xf32>
    %c0_14 = arith.constant 0 : index
    %c0_15 = arith.constant 0 : index
    %c0_16 = arith.constant 0 : index
    %30 = vector.load %arg6[%c0_14, %c0_15, %c0_16] : memref<1x64x128xf32, #tpu.memory_space<vmem>>, vector<1x64x128xf32>
    %31 = vector.shape_cast %30 : vector<1x64x128xf32> to vector<64x128xf32>
    %32 = vector.shape_cast %29 : vector<64x128xf32> to vector<1x64x128xf32>
    tpu.vector_store %arg6[%c0_14, %c0_15, %c0_16], %32 {strides = array<i32>} : memref<1x64x128xf32, #tpu.memory_space<vmem>>, vector<1x64x128xf32>,
    return
  }
  func.func @transform_0(%arg0: i32, %arg1: i32) -> (i32, i32, i32) {
    %c0_i32 = arith.constant 0 : i32
    %c0_i32_0 = arith.constant 0 : i32
    return %arg0, %c0_i32, %arg1 : i32, i32, i32
  }
  func.func @transform_1(%arg0: i32, %arg1: i32) -> (i32, i32) {
    %c0_i32 = arith.constant 0 : i32
    %c0_i32_0 = arith.constant 0 : i32
    %c0_i32_1 = arith.constant 0 : i32
    return %c0_i32, %c0_i32_0 : i32, i32
  }
  func.func @transform_2(%arg0: i32, %arg1: i32) -> (i32, i32) {
    %c0_i32 = arith.constant 0 : i32
    %c0_i32_0 = arith.constant 0 : i32
    %c0_i32_1 = arith.constant 0 : i32
    return %c0_i32, %c0_i32_0 : i32, i32
  }
  func.func @transform_3(%arg0: i32, %arg1: i32) -> (i32, i32) {
    %c0_i32 = arith.constant 0 : i32
    %c0_i32_0 = arith.constant 0 : i32
    %c0_i32_1 = arith.constant 0 : i32
    return %c0_i32, %c0_i32_0 : i32, i32
  }
  func.func @transform_4(%arg0: i32, %arg1: i32) -> (i32, i32, i32) {
    %c0_i32 = arith.constant 0 : i32
    %c0_i32_0 = arith.constant 0 : i32
    return %arg0, %c0_i32, %arg1 : i32, i32, i32
  }
}

</mosaic_0001>

<bundles_post_ra>
// kernel: tpu_custom_call.1
= control target key start
LH: loop header
LB: loop body
LE: loop exit
PB: predicated region body
PF: predicated region fallthrough
CT: control target
= control target key end

     0   :  { %9 = vsyncpa [#allocation3], 0  ;;  %s1061_s0 = inlined_call_operand.vmem [shape: f32[2,32,128], index: 0, kind: input, shape index: {}]   ;;  %s1062_s1 = inlined_call_operand.vmem [shape: f32[64,32], index: 1, kind: input, shape index: {}]   ;;  %s1063_s2 = inlined_call_operand.vmem [shape: f32[64,1], index: 2, kind: input, shape index: {}]   ;;  %s1064_s3 = inlined_call_operand.vmem [shape: f32[64,1], index: 3, kind: input, shape index: {}]   ;;  %s1065_s4 = inlined_call_operand.hbm [shape: f32[2,64,128], index: 4, kind: output, shape index: {}]  }
   0x1   :  { %11 = vsyncpa [#allocation3 + $0x1], 0  ;;  %s859_s15 = smov 0   ;;  %s861_s16 = smov 0  }
   0x2   :  { %s863_s17 = smov 0   ;;  %s865_s18 = smov 0  }
   0x3   :  { %s867_s19 = smov 0   ;;  %s869_s20 = smov 0  }
   0x4 LB: > { %s621_s21 = sadd.s32 4294967295, %s828_s20   ;;  %s622_s22 = sadd.s32 4294967294, %s828_s20   ;;  %s828_s20 = sphi %s869_s20, %s17_s20   ;;  %s824_s19 = sphi %s867_s19, %s1072_s19   ;;  %s820_s18 = sphi %s865_s18, %s1071_s18   ;;  %s816_s17 = sphi %s863_s17, %s1070_s17   ;;  %s812_s16 = sphi %s861_s16, %s1069_s16   ;;  %s808_s15 = sphi %s859_s15, %s1068_s15  }
   0x5   : > { %s29_s23 = sadd.s32 1, %s824_s19  ;;  %s129_s24 = sadd.s32 1, %s816_s17 }
   0x6   : > { %p31_p0 = scmp.ge.s32.totalorder %s29_s23, 2  ;;  %p139_p1 = scmp.ne.s32.totalorder %s816_s17, %s812_s16 }
   0x7   : > { %p140_p2 = scmp.eq.s32.totalorder %s621_s21, 1  ;;  %p145_p3 = scmp.ne.s32.totalorder %s812_s16, %s808_s15 }
   0x8   : > { %s1074_s23 = smov (%p31_p0, %s29_s23), 0  ;;  %p146_p5 = scmp.eq.s32.totalorder %s622_s22, 1 }
   0x9   : > { %p899_p4 = por %p140_p2, %p139_p1  ;;  %s124_s26 = ssub.s32 %s824_s19, %s1074_s23 }
   0xa   : > { %p625_p6 = scmp.ge.s32.totalorder %s828_s20, 1  ;;  %p127_p7 = scmp.eq.s32.totalorder %s124_s26, 0 }
   0xb   : > { %p906_p8 = por %p146_p5, %p145_p3  ;;  %p184_p9 = scmp.lt.s32.totalorder %s828_s20, 3 }
   0xc   : > { %s912_s28 = scalar_select %p127_p7, %s816_s17, %s129_s24  }
   0xd   : > { %p185_p10 = pnand %p625_p6, %p184_p9 }
   0xe   : > { %p213_p11 = scmp.lt.s32.totalorder (!%p185_p10), %s820_s18, 1  ;;  %v254_v0 = vld [vmem:[%s1062_s1] sm:$0xff] (!%p185_p10)  ;;  %vm262_vm0 = vcmask (!%p185_p10), 261120   ;;  %v830_v2 = vmov (!%p185_p10), 0   ;;  %v394_v3 = vld [vmem:[%s1063_s2 + $0x10] sm:$0xff] (!%p185_p10)  ;;  %v395_v5 = vld [vmem:[%s1063_s2 + $0x18] sm:$0xff] (!%p185_p10) }
   0xf   : > { %188 = sbr.rel (%p185_p10) target bundleno = 275 (0x113), region = 36  ;;  %v258_v1 = vld [vmem:[%s1062_s1 + $0x20] sm:$0xff] (!%p185_p10)  ;;  %664 = vmatprep.mubr.msk.f32.mxu0 (!%p185_p10), %vm262_vm0, %v254_v0  ;;  %747 = vset.pattern.permute.xlu1 (!%p185_p10), %v830_v2  ;;  %v393_v6 = vld [vmem:[%s1063_s2 + $0x8] sm:$0xff] (!%p185_p10)  ;;  %v399_v26 = vld [vmem:[%s1063_s2 + $0x38] sm:$0xff] (!%p185_p10)  ;;  %s210_s8 = sand.u32 (!%p185_p10), 1, %s812_s16  }
  0x10   : > { %670 = vmatprep.mubr.msk.f32.mxu1 (!%p185_p10), %vm262_vm0, %v258_v1  ;;  %746 = vset.pattern.permute.xlu0 (!%p185_p10), %v830_v2  ;;  %v392_v4 = vld [vmem:[%s1063_s2] sm:$0xff] (!%p185_p10)  ;;  %v397_v20 = vld [vmem:[%s1063_s2 + $0x28] sm:$0xff] (!%p185_p10)  ;;  %v398_v27 = vld [vmem:[%s1063_s2 + $0x30] sm:$0xff] (!%p185_p10)  ;;  %s1002_s9 = sshll.u32 (!%p185_p10), %s210_s8, 6  ;;  %s643_s10 = sshll.u32 (!%p185_p10), %s820_s18, 10 }
  0x11   : > { %412 = vperm.xlu1 (!%p185_p10), %747, %v394_v3   ;;  %402 = vperm.xlu0 (!%p185_p10), %746, %v392_v4   ;;  %v396_v21 = vld [vmem:[%s1063_s2 + $0x20] sm:$0xff] (!%p185_p10)  ;;  %v255_v28 = vld [vmem:[%s1062_s1 + $0x8] sm:$0xff] (!%p185_p10)  ;;  %v256_v32 = vld [vmem:[%s1062_s1 + $0x10] sm:$0xff] (!%p185_p10)  ;;  %s212_s11 = scalar_lea.vmem (!%p185_p10), [#allocation2], %s1002_s9  ;;  %s1015_s21 = scalar_lea.sflag (!%p185_p10), [#allocation3], %s210_s8 }
  0x12   : > { %v259_v29 = vld [vmem:[%s1062_s1 + $0x28] sm:$0xff] (!%p185_p10)  ;;  %v260_v33 = vld [vmem:[%s1062_s1 + $0x30] sm:$0xff] (!%p185_p10)  ;;  %v464_v37 = vld [vmem:[%s1064_s3] sm:$0xff] (!%p185_p10) }
  0x13   : > { %v465_v36 = vld [vmem:[%s1064_s3 + $0x8] sm:$0xff] (!%p185_p10)  ;;  %v257_v38 = vld [vmem:[%s1062_s1 + $0x18] sm:$0xff] (!%p185_p10)  ;;  %v466_v45 = vld [vmem:[%s1064_s3 + $0x10] sm:$0xff] (!%p185_p10) }
  0x14   : > { %v261_v39 = vld [vmem:[%s1062_s1 + $0x38] sm:$0xff] (!%p185_p10)  ;;  %v469_v50 = vld [vmem:[%s1064_s3 + $0x28] sm:$0xff] (!%p185_p10)  ;;  %v468_v51 = vld [vmem:[%s1064_s3 + $0x20] sm:$0xff] (!%p185_p10) }
  0x15   : > { %417 = vperm.xlu1 (!%p185_p10), %747, %v395_v5   ;;  %407 = vperm.xlu0 (!%p185_p10), %746, %v393_v6   ;;  %v467_v44 = vld [vmem:[%s1064_s3 + $0x18] sm:$0xff] (!%p185_p10)  ;;  %v470_v56 = vld [vmem:[%s1064_s3 + $0x30] sm:$0xff] (!%p185_p10) }
  0x16   : > { %s214_s7 = scalar_select %p213_p11, %s820_s18, 1  ;;  %v471_v55 = vld [vmem:[%s1064_s3 + $0x38] sm:$0xff] }
  0x17   : > { %s1009_s18 = scalar_lea.hbm %s1065_s4, %s643_s10 }
  0x18   : > { %s642_s12 = sshll.u32 %s214_s7, 5 }
  0x19   : > { %s220_s24 = scalar_lea.vmem %s1061_s0, %s642_s12  ;;  %427 = vperm.xlu1 %747, %v397_v20   ;;  %422 = vperm.xlu0 %746, %v396_v21   ;;  %s543_s12 = sshll.u32 %s212_s11, 4  ;;  %s1011_s12 = int_to_ptr.vmem [resolvable:$true] %s543_s12 }
  0x1a   : > { %v221_v7 = vld [vmem:[%s220_s24] sm:$0xff]  ;;  %v222_v8 = vld [vmem:[%s220_s24 + $0x8] sm:$0xff]  ;;  %v223_v9 = vld [vmem:[%s220_s24 + $0x10] sm:$0xff]  ;;  %s750_s22 = scalar_lea.vmem %s1011_s12, 1024 }
  0x1b   : > { %v225_v10 = vadd.f32 %v222_v8, %v221_v7  ;;  %v234_v11 = vmul.f32 %v221_v7, %v221_v7  ;;  %v235_v12 = vmul.f32 %v222_v8, %v222_v8  ;;  %v676_v13 = vpack.c.bf16 %v222_v8, %v221_v7  ;;  %v224_v14 = vld [vmem:[%s220_s24 + $0x18] sm:$0xff]  ;;  %p751_p12 = scmp.ne.s32.totalorder %s1011_s12, %s750_s22  ;;  %s831_s24 = smov [#allocation2]  }
  0x1c   : > { %v236_v15 = vmul.f32 %v223_v9, %v223_v9  ;;  %v680_v16 = vpack.c.bf16 %v224_v14, %v223_v9  ;;  %v237_v19 = vmul.f32 %v224_v14, %v224_v14  ;;  %s754_s26 = sshll.u32 %s831_s24, 4  ;;  %s755_s26 = int_to_ptr.vmem [resolvable:$false] %s754_s26 }
  0x1d   : > { %v238_v17 = vadd.f32 %v235_v12, %v234_v11  ;;  %677 = vmatprep.subr.bf16.mxu0 %v676_v13  ;;  %684 = vmatprep.subr.bf16.mxu1 %v676_v13  ;;  %v226_v18 = vadd.f32 %v225_v10, %v223_v9  ;;  %p752_p13 = pnand %p751_p12, %p899_p4  ;;  %s756_s29 = scalar_lea.vmem %s755_s26, 2048 }
  0x1e   : > { %679 = vmatpush3.bf16.msra.mxu0 %v676_v13  ;;  %686 = vmatpush3.bf16.msra.mxu1 %v676_v13  ;;  %p757_p1 = scmp.lt.s32.totalorder %s1011_s12, %s755_s26  ;;  %p758_p2 = scmp.lt.s32.totalorder %s756_s29, %s750_s22 }
  0x1f   : > { %v227_v22 = vadd.f32 %v226_v18, %v224_v14  ;;  %v239_v23 = vadd.f32 %v238_v17, %v236_v15  ;;  %681 = vmatprep.subr.bf16.mxu0 %v680_v16  ;;  %685 = vmatprep.subr.bf16.mxu1 %v680_v16  ;;  %p753_p0 = pneg %p752_p13 }
  0x20   : > { %437 = vperm.xlu1 %747, %v399_v26   ;;  %432 = vperm.xlu0 %746, %v398_v27   ;;  %p759_p3 = por %p758_p2, %p757_p1 }
  0x21   : > { %v228_v24 = vrot.slane %v227_v22, 4  ;;  %v240_v25 = vadd.f32 %v239_v23, %v237_v19 }
  0x22   : > { %683 = vmatpush3.bf16.msra.mxu0 %v680_v16  ;;  %687 = vmatpush3.bf16.msra.mxu1 %v680_v16  ;;  %p760_p5 = pnand %p759_p3, %p753_p0 }
  0x23   : > { %v229_v30 = vadd.f32 %v228_v24, %v227_v22  ;;  %v241_v31 = vrot.slane %v240_v25, 4 }
  0x24   : > { %479 = vperm.xlu1 %747, %v465_v36   ;;  %474 = vperm.xlu0 %746, %v464_v37  }
  0x25   : > { %v230_v34 = vrot.slane %v229_v30, 2  ;;  %v242_v35 = vadd.f32 %v241_v31, %v240_v25  ;;  %665 = vmatmul.mubr.msk.f32.vlgmr.msra.gmra.mrb[0].mxu0 %vm262_vm0, %v255_v28  ;;  %671 = vmatmul.mubr.msk.f32.vlgmr.msra.gmra.mrb[0].mxu1 %vm262_vm0, %v259_v29 }
  0x26   : > { %667 = vmatprep.mubr.msk.f32.mxu0 %vm262_vm0, %v256_v32  ;;  %673 = vmatprep.mubr.msk.f32.mxu1 %vm262_vm0, %v260_v33 }
  0x27   : > { %v231_v40 = vadd.f32 %v230_v34, %v229_v30  ;;  %v243_v41 = vrot.slane %v242_v35, 2 }
  0x28   : > { %489 = vperm.xlu1 %747, %v467_v44   ;;  %484 = vperm.xlu0 %746, %v466_v45  }
  0x29   : > { %v232_v42 = vrot.slane %v231_v40, 1  ;;  %v244_v43 = vadd.f32 %v243_v41, %v242_v35  ;;  %668 = vmatmul.mubr.msk.f32.gmra.mrb[2].mxu0 %vm262_vm0, %v257_v38  ;;  %674 = vmatmul.mubr.msk.f32.gmra.mrb[2].mxu1 %vm262_vm0, %v261_v39 }
  0x2b   : > { %v233_v46 = vadd.f32 %v232_v42, %v231_v40  ;;  %v245_v47 = vrot.slane %v244_v43, 1 }
  0x2c   : > { %499 = vperm.xlu1 %747, %v469_v50   ;;  %494 = vperm.xlu0 %746, %v468_v51  }
  0x2d   : > { %v246_v48 = vadd.f32 %v245_v47, %v244_v43  ;;  %v247_v49 = vmul.f32 0.03125, %v233_v46 }
  0x2f   : > { %v248_v52 = vmul.f32 0.03125, %v246_v48  ;;  %v249_v53 = vmul.f32 %v247_v49, %v247_v49 }
  0x30   : > { %509 = vperm.xlu1 %747, %v471_v55   ;;  %504 = vperm.xlu0 %746, %v470_v56  }
  0x31   : > { %v250_v54 = vsub.f32 %v248_v52, %v249_v53 }
  0x33   : > { %v251_v63 = vmax.f32 %v250_v54, 0.0 }
  0x35   : > { %v252_v2 = vadd.f32 1e-05, %v251_v63 }
  0x37   : > { %748 = vrsqrt.f32 %v252_v2 }
  0x41   : > { %v749_v9 = vpop.eup %748 }
  0x90   : > { %v413_v57 = vpop.permute.xlu1 %412  ;;  %v403_v58 = vpop.permute.xlu0 %402 }
  0x91   : > { %v440_v10 = vmul.f32 %v403_v58, %v247_v49  ;;  %v442_v26 = vmul.f32 %v413_v57, %v247_v49 }
  0x94   : > { %v418_v59 = vpop.permute.xlu1 %417  ;;  %v408_v60 = vpop.permute.xlu0 %407 }
  0x95   : > { %v441_v7 = vmul.f32 %v408_v60, %v247_v49  ;;  %v443_v21 = vmul.f32 %v418_v59, %v247_v49 }
  0x98   : > { %v428_v61 = vpop.permute.xlu1 %427  ;;  %v423_v62 = vpop.permute.xlu0 %422 }
  0x99   : > { %v445_v8 = vmul.f32 %v428_v61, %v247_v49  ;;  %v444_v11 = vmul.f32 %v423_v62, %v247_v49 }
  0x9f   : > { %v438_v0 = vpop.permute.xlu1 %437  ;;  %v433_v1 = vpop.permute.xlu0 %432 }
  0xa0   : > { %v447_v22 = vmul.f32 %v438_v0, %v247_v49  ;;  %v446_v27 = vmul.f32 %v433_v1, %v247_v49 }
  0xa3   : > { %v480_v3 = vpop.permute.xlu1 %479  ;;  %v475_v4 = vpop.permute.xlu0 %474 }
  0xa7   : > { %v490_v5 = vpop.permute.xlu1 %489  ;;  %v485_v6 = vpop.permute.xlu0 %484 }
  0xab   : > { %v500_v18 = vpop.permute.xlu1 %499  ;;  %v495_v23 = vpop.permute.xlu0 %494 }
  0xaf   : > { %v510_v44 = vpop.permute.xlu1 %509  ;;  %v505_v47 = vpop.permute.xlu0 %504 }
  0xf8   : > { %v666_v12 = vpop.f32.mrb[0].mxu0  ;;  %v672_v13 = vpop.f32.mrb[0].mxu1 }
  0xf9   : > { %v449_v14 = vsub.f32 %v666_v12, %v441_v7  ;;  %v453_v15 = vsub.f32 %v672_v13, %v445_v8  ;;  %v353_v16 = vpop.f32.mrb[1].mxu0  ;;  %v373_v17 = vpop.f32.mrb[1].mxu1 }
  0xfa   : > { %v448_v19 = vsub.f32 %v353_v16, %v440_v10  ;;  %v452_v20 = vsub.f32 %v373_v17, %v444_v11 }
  0xfb   : > { %v457_v24 = vmul.f32 %v749_v9, %v449_v14  ;;  %v461_v25 = vmul.f32 %v749_v9, %v453_v15 }
  0xfc   : > { %v456_v28 = vmul.f32 %v749_v9, %v448_v19  ;;  %v460_v29 = vmul.f32 %v749_v9, %v452_v20  ;;  %v669_v30 = vpop.f32.mrb[2].mxu0  ;;  %v675_v31 = vpop.f32.mrb[2].mxu1 }
  0xfd   : > { %v513_v32 = vadd.f32 %v480_v3, %v457_v24  ;;  %v517_v33 = vadd.f32 %v500_v18, %v461_v25  ;;  %v451_v34 = vsub.f32 %v669_v30, %v443_v21  ;;  %v455_v35 = vsub.f32 %v675_v31, %v447_v22  ;;  %v363_v36 = vpop.f32.mrb[3].mxu0  ;;  %v383_v37 = vpop.f32.mrb[3].mxu1 }
  0xfe   : > { %v512_v38 = vadd.f32 %v475_v4, %v456_v28  ;;  %v516_v39 = vadd.f32 %v495_v23, %v460_v29  ;;  %v450_v40 = vsub.f32 %v363_v36, %v442_v26  ;;  %v454_v41 = vsub.f32 %v383_v37, %v446_v27 }
  0xff   : > { %521 = vst [vmem:[%s212_s11 + $0x8] sm:$0xff] %v513_v32  ;;  %525 = vst [vmem:[%s212_s11 + $0x28] sm:$0xff] %v517_v33  ;;  %v459_v42 = vmul.f32 %v749_v9, %v451_v34  ;;  %v463_v43 = vmul.f32 %v749_v9, %v455_v35 }
 0x100   : > { %520 = vst [vmem:[%s212_s11] sm:$0xff] %v512_v38  ;;  %524 = vst [vmem:[%s212_s11 + $0x20] sm:$0xff] %v516_v39  ;;  %v458_v45 = vmul.f32 %v749_v9, %v450_v40  ;;  %v462_v46 = vmul.f32 %v749_v9, %v454_v41 }
 0x101   : > { %v515_v48 = vadd.f32 %v490_v5, %v459_v42  ;;  %v519_v49 = vadd.f32 %v510_v44, %v463_v43 }
 0x102   : > { %v514_v50 = vadd.f32 %v485_v6, %v458_v45  ;;  %v518_v51 = vadd.f32 %v505_v47, %v462_v46 }
 0x103   : > { %523 = vst [vmem:[%s212_s11 + $0x18] sm:$0xff] %v515_v48  ;;  %527 = vst [vmem:[%s212_s11 + $0x38] sm:$0xff] %v519_v49 }
 0x104   : > { %522 = vst [vmem:[%s212_s11 + $0x10] sm:$0xff] %v514_v50  ;;  %526 = vst [vmem:[%s212_s11 + $0x30] sm:$0xff] %v518_v51 }
 0x105   : > { %763 = shalt.err (!%p760_p5)
}
 0x106   : > { %s764_s30 = scalar_lea.hbm %s1009_s18, 1024  ;;  %s768_s7 = scalar_lea.hbm %s1065_s4, 2048 }
 0x107   : > { %p765_p6 = scmp.ne.s32.totalorder %s1009_s18, %s764_s30  ;;  %p769_p10 = scmp.lt.u32.totalorder %s1009_s18, %s1065_s4 }
 0x108   : > { %p770_p11 = scmp.lt.u32.totalorder %s768_s7, %s764_s30  ;;  %p772_p13 = scmp.lt.u32.totalorder %s764_s30, %s1009_s18 }
 0x109   : > { %p766_p7 = pnand %p765_p6, %p899_p4 }
 0x10a   : > { %p771_p12 = por %p770_p11, %p769_p10 }
 0x10b   : > { %p767_p9 = pneg %p766_p7 }
 0x10c   : > { %p773_p0 = por %p772_p13, %p771_p12 }
 0x10e   : > { %p774_p1 = pnand %p773_p0, %p767_p9 }
 0x110   : > { %777 = shalt.err (!%p774_p1)
}
 0x111   : > { %s832_s10 = smov 128   ;;  %s833_s11 = smov 8  }
 0x112   : > { %688 = dma.vmem_to_hbm [thread:$0]  (%p899_p4), %s1011_s12, 1024, %s1009_s18, %s1015_s21, %s832_s10, %s832_s10, %s833_s11  }
 0x113 PF: > { %p694_p2 = scmp.ge.s32.totalorder %s828_s20, 2  ;;  %s558_s13 = sand.u32 1, %s808_s15  }
 0x114   : > { %s559_s14 = scalar_lea.sflag [#allocation3], %s558_s13 }
 0x115   : > { %p691_p3 = pnand %p694_p2, %p906_p8 }
 0x117   : > { %803 = dma.done.wait (!%p691_p3), %s559_s14, 1024  }
 0x118   : > { %805 = vsyncadd (!%p691_p3), %s559_s14, 4294966272  ;;  %s17_s20 = sadd.s32 1, %s828_s20   ;;  %s1068_s15 = smov %s812_s16 }
 0x119   : > { %p14_p5 = scmp.ge.s32.totalorder %s17_s20, 4   ;;  %s1069_s16 = smov %s816_s17 }
 0x11a   : > { %s1070_s17 = smov %s912_s28  ;;  %s1071_s18 = smov %s824_s19 }
 0x11b   : > { %s1072_s19 = smov %s1074_s23  ;;  %16 = sbr.rel (!%p14_p5) target bundleno = 4 (0x4), region = 71 }
 0x122   :  { %564 = vsyncpa [#allocation3], 1 }
 0x123   :  { %566 = vsyncpa [#allocation3 + $0x1], 1 }

</bundles_post_ra>
